<compile_context>
chip_gen: v7x
topology: tpu7x:2x2x1
jax: 0.10.0
libtpu: 0.0.40
codegen_flags: <defaults>
</compile_context>

<pallas_src>
import math
from functools import partial

import jax
import jax.numpy as jnp
from jax import lax
from jax.experimental import pallas as pl
from jax.experimental.pallas import tpu as pltpu


def _round_up(x, m):
    return (x + m - 1) // m * m


# ---------------------------------------------------------------------------
# Pallas kernel: one (batch, row-tile, C_out-tile) step of the 'same' conv.
# ---------------------------------------------------------------------------
def _doconv_kernel(x_ref, w_ref, o_ref, acc_ref, *, KH, W8, TILE):
    """x_ref:  (1, 1, TILE + 2*pad*W8, KW*C_in)  halo row tile (col-shift-concat)
       w_ref:  (n_co, KH, KW*C_in, tco)          full weight set, VMEM resident
       o_ref:  (1, 1, TILE, tco)                 output tile
       acc_ref:(TILE, tco) f32                   accumulator scratch
    """
    j = pl.program_id(2)  # C_out tile index

    # kh = 0 initializes the accumulator (no zero-init / stale-scratch read).
    acc_ref[...] = jnp.dot(x_ref[0, 0, 0:TILE, :], w_ref[j, 0],
                           preferred_element_type=jnp.float32)
    for kh in range(1, KH):
        off = kh * W8  # multiple of 8 -> sublane-aligned static slice
        acc_ref[...] += jnp.dot(x_ref[0, 0, off:off + TILE, :], w_ref[j, kh],
                                preferred_element_type=jnp.float32)
    o_ref[0, 0, :, :] = acc_ref[...].astype(o_ref.dtype)


# ---------------------------------------------------------------------------
# Convolution wrapper ('same' conv: stride=1, dilation=1, zero padding).
# ---------------------------------------------------------------------------
def doconv2d_conv(x, w_taps, KH, KW, pad, *, compute_dtype=jnp.bfloat16,
                  out_dtype=None, tile_co=256, tile_rows=None,
                  vmem_limit_bytes=None):
    """Conv of NCHW `x` with per-tap weights w_taps[kh*KW + kw, c_in, c_out]."""
    B, C_in, H, W = x.shape
    taps, _, C_out = w_taps.shape
    assert taps == KH * KW
    assert 2 * pad == KH - 1 and 2 * pad == KW - 1, (
        "kernel implements the 'same' case (stride=1, 2*padding == k-1)")
    # TODO(synk): stride>1 / dilation>1 / groups>1 and reflect/replicate/
    # circular padding modes (non-default options) are not implemented.

    out_dtype = compute_dtype if out_dtype is None else out_dtype
    c_item = jnp.dtype(compute_dtype).itemsize
    o_item = jnp.dtype(out_dtype).itemsize

    KWC = KW * C_in                      # contraction depth per kh tap
    W8 = _round_up(W, 8)                 # image row width, sublane aligned
    C_out_p = _round_up(C_out, 128)      # lane-dense, unmasked output stores

    # C_out tile (multiple of 128; 256 suits v6e/v7x MXU, pass 128 on v5e).
    tco = min(C_out_p, max(128, _round_up(tile_co, 128)))
    while C_out_p % tco:
        tco -= 128
    n_co = C_out_p // tco

    # Row tile: keep (x halo + resident weights + out + f32 acc) under budget.
    if tile_rows is None:
        tile_rows = max(1, 2048 // W8)
    TR = max(1, min(H, int(tile_rows)))

    def vmem_est(tr):
        tile = tr * W8
        tile_h = (tr + 2 * pad) * W8
        return (2 * tile_h * KWC * c_item          # x row tile (double buffered)
                + 2 * KH * KWC * C_out_p * c_item  # resident weights (x2 bufs)
                + 2 * tile * tco * o_item          # output tile (double buffered)
                + tile * tco * 4)                  # f32 accumulator scratch

    while TR > 1 and vmem_est(TR) > (20 << 20):
        TR = max(1, TR // 2)
    n_rt = -(-H // TR)
    H_t = n_rt * TR
    TILE = TR * W8
    TILE_H = (TR + 2 * pad) * W8

    if vmem_limit_bytes is None:
        est = vmem_est(TR)
        vmem_limit_bytes = None if est <= (12 << 20) else int(min(2 * est, 96 << 20))

    # ---- weights: (KH*KW, C_in, C_out) -> (n_co, KH, KW*C_in, tco) ----------
    w_kh = w_taps.reshape(KH, KW, C_in, C_out).reshape(KH, KWC, C_out)
    w_p = jnp.pad(w_kh, ((0, 0), (0, 0), (0, C_out_p - C_out))).astype(compute_dtype)
    w_t = w_p.reshape(KH, KWC, n_co, tco).transpose(2, 0, 1, 3)

    # ---- input: NCHW -> NHWC, fold kw into channels (column-shift concat),
    #      pad rows/cols, duplicate halo rows per tile.  One fused XLA layout
    #      pass of ~KW x the input bytes; kills all in-kernel masks/shifts.
    # TODO(synk): if the surrounding model is already NHWC the two transposes
    # at the op boundary disappear.
    x_nhwc = jnp.transpose(x, (0, 2, 3, 1)).astype(compute_dtype)
    if KW > 1:
        x_wpad = jnp.pad(x_nhwc, ((0, 0), (0, 0), (pad, pad), (0, 0)))
        x_cs = jnp.concatenate([x_wpad[:, :, kw:kw + W, :] for kw in range(KW)],
                               axis=-1)                    # (B, H, W, KW*C_in)
    else:
        x_cs = x_nhwc
    # rows: conv pad on top, conv pad + tile-rounding pad on the bottom;
    # cols: pad W up to W8 with zeros (zero outputs, sliced off afterwards).
    x_cs = jnp.pad(x_cs, ((0, 0), (pad, H_t - H + pad), (0, W8 - W), (0, 0)))
    x_t = jnp.stack([x_cs[:, t * TR:t * TR + TR + 2 * pad] for t in range(n_rt)],
                    axis=1).reshape(B, n_rt, TILE_H, KWC)

    kernel = partial(_doconv_kernel, KH=KH, W8=W8, TILE=TILE)

    cost = pl.CostEstimate(
        flops=2 * KH * B * n_rt * TILE * KWC * C_out_p,
        transcendentals=0,
        bytes_accessed=(B * n_rt * TILE_H * KWC * c_item    # x: once per (b, t)
                        + KH * KWC * C_out_p * c_item       # weights: once
                        + B * n_rt * TILE * C_out_p * o_item))

    out = pl.pallas_call(
        kernel,
        out_shape=jax.ShapeDtypeStruct((B, n_rt, TILE, C_out_p), out_dtype),
        grid=(B, n_rt, n_co),
        in_specs=[
            # x row tile: block index constant across the inner C_out axis, so
            # each halo tile is DMA'd once per (b, t) and reused for all j.
            pl.BlockSpec((1, 1, TILE_H, KWC), lambda b, t, j: (b, t, 0, 0)),
            # full weight set, constant index map -> single DMA, VMEM resident.
            pl.BlockSpec((n_co, KH, KWC, tco), lambda b, t, j: (0, 0, 0, 0)),
        ],
        out_specs=pl.BlockSpec((1, 1, TILE, tco), lambda b, t, j: (b, t, 0, j)),
        scratch_shapes=[pltpu.VMEM((TILE, tco), jnp.float32)],
        compiler_params=pltpu.CompilerParams(
            dimension_semantics=("parallel", "parallel", "parallel"),
            vmem_limit_bytes=vmem_limit_bytes),
        cost_estimate=cost,
    )(x_t, w_t)

    # (B, n_rt, TR*W8, C_out_p) -> NCHW (B, C_out, H, W)
    out = out.reshape(B, H_t, W8, C_out_p)[:, :H, :W, :C_out]
    return jnp.transpose(out, (0, 3, 1, 2)).astype(x.dtype)


# ---------------------------------------------------------------------------
# DOConv2d forward (groups=1, bias=False, simam=False, stride=1, zero pad).
# ---------------------------------------------------------------------------
def doconv2d_forward(x, Wp, Dp, D_diag, M=3, N=3, padding=1,
                     compute_dtype=jnp.bfloat16, **conv_kwargs):
    # DoW composition: DoW[o, i, m] = sum_s (D + D_diag)[i, m, s] * W[o, i, s].
    # Tiny FLOP count -> left to XLA, emitted directly in the (tap, C_in,
    # C_out) layout the conv kernel consumes.
    D = Dp + D_diag                                     # (C_in, M*N, D_mul)
    w_taps = jnp.einsum('ims,ois->mio', D, Wp)          # (M*N, C_in, C_out)
    # TODO(synk): simam=True branch (simam_module on half of DoW) and bias are
    # not implemented; module defaults are simam=False, bias=False.
    return doconv2d_conv(x, w_taps, M, N, padding,
                         compute_dtype=compute_dtype, **conv_kwargs)


# ---------------------------------------------------------------------------
# Deterministic parameter initialization (shapes from DOConv2d.__init__).
# ---------------------------------------------------------------------------
def init_params(key, in_channels, out_channels, M=3, N=3, D_mul=None):
    D_mul = M * N if (D_mul is None or M * N <= 1) else D_mul
    k_w, k_d = jax.random.split(key)

    # kaiming_uniform_(a=sqrt(5)) on W of shape (C_out, C_in, D_mul)
    fan_in = in_channels * D_mul
    gain = math.sqrt(2.0 / (1.0 + 5.0))
    bound = gain * math.sqrt(3.0 / fan_in)
    Wp = jax.random.uniform(k_w, (out_channels, in_channels, D_mul),
                            minval=-bound, maxval=bound, dtype=jnp.float32)

    # Module inits D to zeros; use small deterministic random values so the
    # over-parameterization (D + D_diag) path is actually exercised.
    Dp = 0.1 * jax.random.normal(k_d, (in_channels, M * N, D_mul),
                                 dtype=jnp.float32)

    eye = jnp.eye(M * N, dtype=jnp.float32)[None]                # (1, MN, MN)
    D_diag = jnp.tile(eye, (in_channels, 1, D_mul // (M * N)))
    if D_mul % (M * N) != 0:
        D_diag = jnp.concatenate(
            [D_diag,
             jnp.zeros((in_channels, M * N, D_mul % (M * N)), jnp.float32)],
            axis=2)
    return Wp, Dp, D_diag


# ---------------------------------------------------------------------------
# Pure-JAX reference (mirrors the PyTorch forward).
# ---------------------------------------------------------------------------
def doconv2d_reference(x, Wp, Dp, D_diag, M=3, N=3, padding=1):
    C_out, C_in, _ = Wp.shape
    D = Dp + D_diag
    dow = jnp.einsum('ims,ois->oim', D, Wp).reshape(C_out, C_in, M, N)
    return lax.conv_general_dilated(
        x, dow, window_strides=(1, 1),
        padding=((padding, padding), (padding, padding)),
        dimension_numbers=('NCHW', 'OIHW', 'NCHW'))


# ---------------------------------------------------------------------------
if __name__ == "__main__":
    key = jax.random.PRNGKey(0)
    k_x, k_p, k_x2, k_p2 = jax.random.split(key, 4)

    # Module-default config at small shapes.
    B, C_in, C_out, H, W = 2, 4, 8, 16, 16
    M = N = 3

    x = jax.random.normal(k_x, (B, C_in, H, W), dtype=jnp.float32)
    Wp, Dp, D_diag = init_params(k_p, C_in, C_out, M, N)
    ref = jax.block_until_ready(
        doconv2d_reference(x, Wp, Dp, D_diag, M, N, padding=1))

    # f32 compute path, forced multi-row-tile grid (n_rt=2): checks the halo /
    # row-tile / column-shift indexing exactly.
    out_f32 = jax.block_until_ready(
        doconv2d_forward(x, Wp, Dp, D_diag, M, N, padding=1,
                         compute_dtype=jnp.float32, tile_rows=8))
    assert out_f32.shape == (B, C_out, H, W), out_f32.shape
    err_f32 = float(jnp.max(jnp.abs(out_f32 - ref)))
    assert jnp.allclose(out_f32, ref, atol=1e-4, rtol=1e-4), err_f32

    # bf16 MXU path with bf16 output writeback (default, fast path).
    out_bf16 = jax.block_until_ready(
        doconv2d_forward(x, Wp, Dp, D_diag, M, N, padding=1,
                         compute_dtype=jnp.bfloat16))
    err_bf16 = float(jnp.max(jnp.abs(out_bf16 - ref)))
    assert jnp.allclose(out_bf16, ref, atol=5e-2, rtol=5e-2), err_bf16

    # Odd spatial / channel sizes: exercises the W->W8 lane padding and a row
    # count that does not divide the row tile.
    B2, C_in2, C_out2, H2, W2 = 1, 3, 5, 10, 12
    x2 = jax.random.normal(k_x2, (B2, C_in2, H2, W2), dtype=jnp.float32)
    Wp2, Dp2, Dd2 = init_params(k_p2, C_in2, C_out2, M, N)
    ref2 = jax.block_until_ready(
        doconv2d_reference(x2, Wp2, Dp2, Dd2, M, N, padding=1))
    out2 = jax.block_until_ready(
        doconv2d_forward(x2, Wp2, Dp2, Dd2, M, N, padding=1,
                         compute_dtype=jnp.float32, tile_rows=4))
    err2 = float(jnp.max(jnp.abs(out2 - ref2)))
    assert jnp.allclose(out2, ref2, atol=1e-4, rtol=1e-4), err2

    print("KERNEL_OK")
</pallas_src>

<mosaic_0001>
module attributes {stable_mosaic.version = 11 : i64} {
  func.func @_doconv_kernel(%arg0: i32, %arg1: i32, %arg2: i32, %arg3: memref<1x1x160x12xf32, #tpu.memory_space<vmem>>, %arg4: memref<1x3x12x128xf32, #tpu.memory_space<vmem>>, %arg5: memref<1x1x128x128xf32, #tpu.memory_space<vmem>>, %arg6: memref<128x128xf32, #tpu.memory_space<vmem>>) attributes {dimension_semantics = [#tpu.dimension_semantics<parallel>, #tpu.dimension_semantics<parallel>, #tpu.dimension_semantics<parallel>], iteration_bounds = array<i64: 2, 2, 1>, scalar_prefetch = 0 : i64, scratch_operands = 1 : i64, tpu.core_type = #tpu.core_type<tc>, window_params = [{transform_indices = @transform_0, window_bounds = array<i64: 1, 1, 160, 12>}, {pipeline_mode = #tpu.pipeline_mode<synchronous>, transform_indices = @transform_1, window_bounds = array<i64: 1, 3, 12, 128>}, {transform_indices = @transform_2, window_bounds = array<i64: 1, 1, 128, 128>}]} {
    %c0 = arith.constant 0 : index
    %c0_0 = arith.constant 0 : index
    %c0_1 = arith.constant 0 : index
    %c0_2 = arith.constant 0 : index
    %0 = vector.load %arg3[%c0, %c0_0, %c0_1, %c0_2] : memref<1x1x160x12xf32, #tpu.memory_space<vmem>>, vector<1x1x128x12xf32>
    %1 = vector.shape_cast %0 : vector<1x1x128x12xf32> to vector<128x12xf32>
    %2 = arith.index_cast %arg2 : i32 to index
    %c0_3 = arith.constant 0 : index
    %c0_4 = arith.constant 0 : index
    %c0_5 = arith.constant 0 : index
    %3 = vector.load %arg4[%2, %c0_3, %c0_4, %c0_5] : memref<1x3x12x128xf32, #tpu.memory_space<vmem>>, vector<1x1x12x128xf32>
    %4 = vector.shape_cast %3 : vector<1x1x12x128xf32> to vector<12x128xf32>
    %cst = arith.constant dense<0.000000e+00> : vector<128x128xf32>
    %5 = tpu.matmul %1, %4, %cst {dimension_numbers = #tpu.dot_dimension_numbers<[1], [0], [0], [1], [0, 0, 1, 1], [], []>} : vector<128x12xf32>, vector<12x128xf32>, vector<128x128xf32> -> vector<128x128xf32>
    %c0_6 = arith.constant 0 : index
    %c0_7 = arith.constant 0 : index
    %6 = vector.load %arg6[%c0_6, %c0_7] : memref<128x128xf32, #tpu.memory_space<vmem>>, vector<128x128xf32>
    tpu.vector_store %arg6[%c0_6, %c0_7], %5 {strides = array<i32>} : memref<128x128xf32, #tpu.memory_space<vmem>>, vector<128x128xf32>,
    %c0_8 = arith.constant 0 : index
    %c0_9 = arith.constant 0 : index
    %7 = vector.load %arg6[%c0_8, %c0_9] : memref<128x128xf32, #tpu.memory_space<vmem>>, vector<128x128xf32>
    %c0_10 = arith.constant 0 : index
    %c0_11 = arith.constant 0 : index
    %c16 = arith.constant 16 : index
    %c0_12 = arith.constant 0 : index
    %8 = vector.load %arg3[%c0_10, %c0_11, %c16, %c0_12] : memref<1x1x160x12xf32, #tpu.memory_space<vmem>>, vector<1x1x128x12xf32>
    %9 = vector.shape_cast %8 : vector<1x1x128x12xf32> to vector<128x12xf32>
    %10 = arith.index_cast %arg2 : i32 to index
    %c1 = arith.constant 1 : index
    %c0_13 = arith.constant 0 : index
    %c0_14 = arith.constant 0 : index
    %11 = vector.load %arg4[%10, %c1, %c0_13, %c0_14] : memref<1x3x12x128xf32, #tpu.memory_space<vmem>>, vector<1x1x12x128xf32>
    %12 = vector.shape_cast %11 : vector<1x1x12x128xf32> to vector<12x128xf32>
    %cst_15 = arith.constant dense<0.000000e+00> : vector<128x128xf32>
    %13 = tpu.matmul %9, %12, %cst_15 {dimension_numbers = #tpu.dot_dimension_numbers<[1], [0], [0], [1], [0, 0, 1, 1], [], []>} : vector<128x12xf32>, vector<12x128xf32>, vector<128x128xf32> -> vector<128x128xf32>
    %14 = arith.addf %7, %13 : vector<128x128xf32>
    %c0_16 = arith.constant 0 : index
    %c0_17 = arith.constant 0 : index
    %15 = vector.load %arg6[%c0_16, %c0_17] : memref<128x128xf32, #tpu.memory_space<vmem>>, vector<128x128xf32>
    tpu.vector_store %arg6[%c0_16, %c0_17], %14 {strides = array<i32>} : memref<128x128xf32, #tpu.memory_space<vmem>>, vector<128x128xf32>,
    %c0_18 = arith.constant 0 : index
    %c0_19 = arith.constant 0 : index
    %16 = vector.load %arg6[%c0_18, %c0_19] : memref<128x128xf32, #tpu.memory_space<vmem>>, vector<128x128xf32>
    %c0_20 = arith.constant 0 : index
    %c0_21 = arith.constant 0 : index
    %c32 = arith.constant 32 : index
    %c0_22 = arith.constant 0 : index
    %17 = vector.load %arg3[%c0_20, %c0_21, %c32, %c0_22] : memref<1x1x160x12xf32, #tpu.memory_space<vmem>>, vector<1x1x128x12xf32>
    %18 = vector.shape_cast %17 : vector<1x1x128x12xf32> to vector<128x12xf32>
    %19 = arith.index_cast %arg2 : i32 to index
    %c2 = arith.constant 2 : index
    %c0_23 = arith.constant 0 : index
    %c0_24 = arith.constant 0 : index
    %20 = vector.load %arg4[%19, %c2, %c0_23, %c0_24] : memref<1x3x12x128xf32, #tpu.memory_space<vmem>>, vector<1x1x12x128xf32>
    %21 = vector.shape_cast %20 : vector<1x1x12x128xf32> to vector<12x128xf32>
    %cst_25 = arith.constant dense<0.000000e+00> : vector<128x128xf32>
    %22 = tpu.matmul %18, %21, %cst_25 {dimension_numbers = #tpu.dot_dimension_numbers<[1], [0], [0], [1], [0, 0, 1, 1], [], []>} : vector<128x12xf32>, vector<12x128xf32>, vector<128x128xf32> -> vector<128x128xf32>
    %23 = arith.addf %16, %22 : vector<128x128xf32>
    %c0_26 = arith.constant 0 : index
    %c0_27 = arith.constant 0 : index
    %24 = vector.load %arg6[%c0_26, %c0_27] : memref<128x128xf32, #tpu.memory_space<vmem>>, vector<128x128xf32>
    tpu.vector_store %arg6[%c0_26, %c0_27], %23 {strides = array<i32>} : memref<128x128xf32, #tpu.memory_space<vmem>>, vector<128x128xf32>,
    %c0_28 = arith.constant 0 : index
    %c0_29 = arith.constant 0 : index
    %25 = vector.load %arg6[%c0_28, %c0_29] : memref<128x128xf32, #tpu.memory_space<vmem>>, vector<128x128xf32>
    %c0_30 = arith.constant 0 : index
    %c0_31 = arith.constant 0 : index
    %c0_32 = arith.constant 0 : index
    %c0_33 = arith.constant 0 : index
    %26 = vector.load %arg5[%c0_30, %c0_31, %c0_32, %c0_33] : memref<1x1x128x128xf32, #tpu.memory_space<vmem>>, vector<1x1x128x128xf32>
    %27 = vector.shape_cast %26 : vector<1x1x128x128xf32> to vector<128x128xf32>
    %28 = vector.shape_cast %25 : vector<128x128xf32> to vector<1x1x128x128xf32>
    tpu.vector_store %arg5[%c0_30, %c0_31, %c0_32, %c0_33], %28 {strides = array<i32>} : memref<1x1x128x128xf32, #tpu.memory_space<vmem>>, vector<1x1x128x128xf32>,
    return
  }
  func.func @transform_0(%arg0: i32, %arg1: i32, %arg2: i32) -> (i32, i32, i32, i32) {
    %c0_i32 = arith.constant 0 : i32
    %c0_i32_0 = arith.constant 0 : i32
    %c0_i32_1 = arith.constant 0 : i32
    return %arg0, %arg1, %c0_i32, %c0_i32_0 : i32, i32, i32, i32
  }
  func.func @transform_1(%arg0: i32, %arg1: i32, %arg2: i32) -> (i32, i32, i32, i32) {
    %c0_i32 = arith.constant 0 : i32
    %c0_i32_0 = arith.constant 0 : i32
    %c0_i32_1 = arith.constant 0 : i32
    %c0_i32_2 = arith.constant 0 : i32
    %c0_i32_3 = arith.constant 0 : i32
    return %c0_i32, %c0_i32_0, %c0_i32_1, %c0_i32_2 : i32, i32, i32, i32
  }
  func.func @transform_2(%arg0: i32, %arg1: i32, %arg2: i32) -> (i32, i32, i32, i32) {
    %c0_i32 = arith.constant 0 : i32
    %c0_i32_0 = arith.constant 0 : i32
    return %arg0, %arg1, %c0_i32, %arg2 : i32, i32, i32, i32
  }
}

</mosaic_0001>

<bundles_post_ra>
// kernel: tpu_custom_call.1
= control target key start
LH: loop header
LB: loop body
LE: loop exit
PB: predicated region body
PF: predicated region fallthrough
CT: control target
= control target key end

     0   :  { %7 = vsyncpa [#allocation4], 0  ;;  %s1807_s0 = inlined_call_operand.vmem [shape: f32[2,2,160,12], index: 0, kind: input, shape index: {}]   ;;  %s1808_s1 = inlined_call_operand.vmem [shape: f32[1,3,12,128], index: 1, kind: input, shape index: {}]   ;;  %s1809_s2 = inlined_call_operand.hbm [shape: f32[2,2,128,128], index: 2, kind: output, shape index: {}]  }
   0x1   :  { %9 = vsyncpa [#allocation4 + $0x1], 0  ;;  %s1536_s9 = smov 0   ;;  %s1538_s10 = smov 0  }
   0x2   :  { %s1540_s11 = smov 0   ;;  %s1542_s12 = smov 0  }
   0x3   :  { %s1544_s13 = smov 0   ;;  %s1546_s14 = smov 0  }
   0x4   :  { %s1548_s15 = smov 0   ;;  %s1550_s16 = smov 0  }
   0x5 LB: > { %s1087_s17 = sadd.s32 4294967295, %s1515_s16   ;;  %s1088_s18 = sadd.s32 4294967294, %s1515_s16   ;;  %s1515_s16 = sphi %s1550_s16, %s15_s16   ;;  %s1511_s15 = sphi %s1548_s15, %s1820_s15   ;;  %s1507_s14 = sphi %s1546_s14, %s1819_s14   ;;  %s1503_s13 = sphi %s1544_s13, %s1818_s13   ;;  %s1499_s12 = sphi %s1542_s12, %s1817_s12   ;;  %s1495_s11 = sphi %s1540_s11, %s1816_s11   ;;  %s1491_s10 = sphi %s1538_s10, %s1815_s10   ;;  %s1487_s9 = sphi %s1536_s9, %s1814_s9  }
   0x6   : > { %s30_s19 = sadd.s32 1, %s1507_s14  ;;  %s34_s20 = sadd.s32 1, %s1511_s15 }
   0x7   : > { %p32_p0 = scmp.ge.s32.totalorder %s30_s19, 2  ;;  %p104_p1 = scmp.ne.s32.totalorder %s1495_s11, %s1491_s10 }
   0x8   : > { %p105_p2 = scmp.eq.s32.totalorder %s1087_s17, 3  ;;  %p110_p5 = scmp.ne.s32.totalorder %s1491_s10, %s1487_s9 }
   0x9   : > { %s1822_s19 = smov (%p32_p0, %s30_s19), 0  ;;  %s1824_s20 = smov (!%p32_p0, %s34_s20), %s1511_s15 }
   0xa   : > { %s88_s21 = ssub.s32 %s1507_s14, %s1822_s19  ;;  %p1587_p3 = por %p105_p2, %p104_p1 }
   0xb   : > { %p36_p4 = scmp.ge.s32.totalorder %s1824_s20, 2  ;;  %p111_p6 = scmp.eq.s32.totalorder %s1088_s18, 3 }
   0xc   : > { %p1091_p7 = scmp.ge.s32.totalorder %s1515_s16, 1  ;;  %p144_p9 = scmp.lt.s32.totalorder %s1515_s16, 5 }
   0xd   : > { %s1826_s20 = smov (%p36_p4, %s1824_s20), 0  ;;  %p1596_p8 = por %p111_p6, %p110_p5 }
   0xe   : > { %s87_s24 = ssub.s32 %s1511_s15, %s1826_s20  ;;  %s94_s25 = sadd.s32 1, %s1495_s11 }
   0xf   : > { %s89_s26 = sor.u32 %s88_s21, %s87_s24  ;;  %p145_p10 = pnand %p1091_p7, %p144_p9 }
  0x10   : > { %p92_p11 = scmp.eq.s32.totalorder %s89_s26, 0  ;;  %v197_v0 = vld [vmem:[%s1808_s1] sm:$0xff] (!%p145_p10)  ;;  %v198_v1 = vld [vmem:[%s1808_s1 + $0x8] sm:$0xf] (!%p145_p10)  ;;  %vm248_vm0 = vcmask (!%p145_p10), 1043456   ;;  %v1111_v2 = vld [vmem:[%s1808_s1 + $0x10] sm:$0xff] (!%p145_p10) }
  0x11   : > { %148 = sbr.rel (%p145_p10) target bundleno = 308 (0x134), region = 28  ;;  %v1293_v3 = vpack.c.bf16 (!%p145_p10), %v198_v1, %v197_v0  ;;  %vm1517_vm1 = vmmov (!%p145_p10), 1   ;;  %v1112_v5 = vld [vmem:[%s1808_s1 + $0x18] sm:$0xf] (!%p145_p10)  ;;  %p170_p12 = scmp.lt.s32.totalorder (!%p145_p10), %s1503_s13, 1  ;;  %v1130_v6 = vld [vmem:[%s1808_s1 + $0x20] sm:$0xff] (!%p145_p10) }
  0x12   : > { %s1605_s27 = scalar_select %p92_p11, %s1495_s11, %s94_s25  }
  0x13   : > { %vm1616_vm2 = vmpackc.low (!%p145_p10), %vm248_vm0, %vm1517_vm1  ;;  %p172_p13 = scmp.lt.s32.totalorder (!%p145_p10), %s1499_s12, 1  ;;  %v1299_v7 = vpack.c.bf16 (!%p145_p10), %v1112_v5, %v1111_v2  ;;  %v1131_v8 = vld [vmem:[%s1808_s1 + $0x28] sm:$0xf] (!%p145_p10)  ;;  %vm199_vm3 = vcmask (!%p145_p10), 97280   ;;  %s167_s6 = sand.u32 (!%p145_p10), 1, %s1491_s10  }
  0x14   : > { %1295 = vmatprep.subr.msk.bf16.mxu1 (!%p145_p10), %vm1616_vm2, %v1293_v3  ;;  %v1305_v9 = vpack.c.bf16 (!%p145_p10), %v1131_v8, %v1130_v6  ;;  %s1092_s7 = sshll.u32 (!%p145_p10), %s167_s6, 7  ;;  %s1150_s17 = sshll.u32 (!%p145_p10), %s1499_s12, 4 }
  0x15   : > { %1301 = vmatprep.subr.msk.bf16.mxu0 (!%p145_p10), %vm1616_vm2, %v1299_v7  ;;  %1298 = vmatpush3.bf16.msk.msra.mxu1 (!%p145_p10), %vm1616_vm2, %v1293_v3  ;;  %s1725_s8 = scalar_lea.vmem (!%p145_p10), [#allocation3], %s1092_s7  ;;  %s1151_s18 = sshll.u32 (!%p145_p10), %s1503_s13, 5 }
  0x16   : > { %1304 = vmatpush3.bf16.msk.msra.mxu0 (!%p145_p10), %vm1616_vm2, %v1299_v7  ;;  %1311 = vmatprep.subr.msk.bf16.mxu1 (!%p145_p10), %vm1616_vm2, %v1299_v7  ;;  %s987_s21 = sadd.s32 (!%p145_p10), %s1151_s18, %s1150_s17 }
  0x17   : > { %1307 = vmatprep.subr.msk.bf16.mxu0 (!%p145_p10), %vm1616_vm2, %v1305_v9 }
  0x18   : > { %s171_s24 = scalar_select %p170_p12, %s1503_s13, 1 }
  0x19   : > { %s173_s25 = scalar_select %p172_p13, %s1499_s12, 1 }
  0x1a   : > { %s1346_s26 = smul.u32 40, %s171_s24  ;;  %s1152_s12 = sshll.u32 %s987_s21, 7 }
  0x1b   : > { %s1345_s28 = smul.u32 20, %s173_s25  ;;  %s990_s13 = sshll.u32 %s1725_s8, 4  ;;  %s1749_s13 = int_to_ptr.vmem [resolvable:$true] %s990_s13 }
  0x1d   : > { %s176_s29 = sadd.s32 %s1346_s26, %s1345_s28  ;;  %s1747_s26 = scalar_lea.hbm %s1809_s2, %s1152_s12 }
  0x1e   : > { %s1093_s30 = sshll.u32 %s176_s29, 3  ;;  %s1755_s28 = scalar_lea.sflag [#allocation4], %s167_s6 }
  0x1f   : > { %s1648_s5 = scalar_lea.vmem %s1807_s0, %s1093_s30  ;;  %s1421_s29 = scalar_lea.vmem %s1749_s13, 2048 }
  0x20   : > { %v179_v10 = vld [vmem:[%s1648_s5] sm:$0xff]  ;;  %v429_v11 = vld [vmem:[%s1648_s5 + $0x10] sm:$0xff]  ;;  %v180_v12 = vld [vmem:[%s1648_s5 + $0x8] sm:$0xff]  ;;  %p1422_p0 = scmp.ne.s32.totalorder %s1749_s13, %s1421_s29  ;;  %s1518_s30 = smov [#allocation3]  }
  0x21   : > { %1213 = vmatprep.mubr.msk.f32.mxu1 %vm199_vm3, %v179_v10  ;;  %1241 = vmatprep.mubr.msk.f32.mxu0 %vm199_vm3, %v429_v11  ;;  %v430_v13 = vld [vmem:[%s1648_s5 + $0x18] sm:$0xff]  ;;  %v431_v14 = vld [vmem:[%s1648_s5 + $0x20] sm:$0xff]  ;;  %v432_v15 = vld [vmem:[%s1648_s5 + $0x28] sm:$0xff]  ;;  %s1425_s3 = sshll.u32 %s1518_s30, 4  ;;  %s1426_s3 = int_to_ptr.vmem [resolvable:$false] %s1425_s3 }
  0x22   : > { %1214 = vmatmul.mubr.msk.f32.vlgmr.msra.gmra.mrb[0].mxu1 %vm199_vm3, %v180_v12  ;;  %1242 = vmatmul.mubr.msk.f32.vlgmr.msra.gmra.mrb[0].mxu0 %vm199_vm3, %v430_v13  ;;  %v433_v16 = vld [vmem:[%s1648_s5 + $0x30] sm:$0xff]  ;;  %v434_v17 = vld [vmem:[%s1648_s5 + $0x38] sm:$0xff]  ;;  %v435_v18 = vld [vmem:[%s1648_s5 + $0x40] sm:$0xff]  ;;  %p1423_p1 = pnand %p1422_p0, %p1587_p3  ;;  %s1427_s4 = scalar_lea.vmem %s1426_s3, 4096 }
  0x23   : > { %1312 = vmatpush3.bf16.msk.msra.mxu1 %vm1616_vm2, %v1299_v7  ;;  %1310 = vmatpush3.bf16.msk.msra.mxu0 %vm1616_vm2, %v1305_v9  ;;  %v436_v19 = vld [vmem:[%s1648_s5 + $0x48] sm:$0xff]  ;;  %v189_v20 = vld [vmem:[%s1648_s5 + $0x50] sm:$0xff]  ;;  %v190_v21 = vld [vmem:[%s1648_s5 + $0x58] sm:$0xff]  ;;  %p1428_p4 = scmp.lt.s32.totalorder %s1749_s13, %s1426_s3  ;;  %p1429_p5 = scmp.lt.s32.totalorder %s1427_s4, %s1421_s29 }
  0x24   : > { %1216 = vmatprep.mubr.msk.f32.mxu1 %vm199_vm3, %v429_v11  ;;  %1244 = vmatprep.mubr.msk.f32.mxu0 %vm199_vm3, %v431_v14  ;;  %v191_v22 = vld [vmem:[%s1648_s5 + $0x60] sm:$0xff]  ;;  %v192_v23 = vld [vmem:[%s1648_s5 + $0x68] sm:$0xff]  ;;  %v193_v24 = vld [vmem:[%s1648_s5 + $0x70] sm:$0xff]  ;;  %p1424_p2 = pneg %p1423_p1 }
  0x25   : > { %v194_v25 = vld [vmem:[%s1648_s5 + $0x78] sm:$0xff]  ;;  %v705_v26 = vld [vmem:[%s1648_s5 + $0x80] sm:$0xff]  ;;  %v706_v27 = vld [vmem:[%s1648_s5 + $0x88] sm:$0xff]  ;;  %p1430_p6 = por %p1429_p5, %p1428_p4 }
  0x26   : > { %1217 = vmatmul.mubr.msk.f32.gmra.mrb[2].mxu1 %vm199_vm3, %v430_v13  ;;  %1245 = vmatmul.mubr.msk.f32.gmra.mrb[2].mxu0 %vm199_vm3, %v432_v15  ;;  %v707_v28 = vld [vmem:[%s1648_s5 + $0x90] sm:$0xff]  ;;  %v708_v29 = vld [vmem:[%s1648_s5 + $0x98] sm:$0xff] }
  0x27   : > { %1219 = vmatprep.mubr.msk.f32.mxu1 %vm199_vm3, %v431_v14  ;;  %1247 = vmatprep.mubr.msk.f32.mxu0 %vm199_vm3, %v433_v16  ;;  %p1431_p7 = pnand %p1430_p6, %p1424_p2 }
  0x2a   : > { %1220 = vmatmul.mubr.msk.f32.gmra.mrb[4].mxu1 %vm199_vm3, %v432_v15  ;;  %1248 = vmatmul.mubr.msk.f32.gmra.mrb[4].mxu0 %vm199_vm3, %v434_v17 }
  0x2b   : > { %1222 = vmatprep.mubr.msk.f32.mxu1 %vm199_vm3, %v433_v16  ;;  %1250 = vmatprep.mubr.msk.f32.mxu0 %vm199_vm3, %v435_v18 }
  0x2e   : > { %1223 = vmatmul.mubr.msk.f32.gmra.mrb[6].mxu1 %vm199_vm3, %v434_v17  ;;  %1251 = vmatmul.mubr.msk.f32.gmra.mrb[6].mxu0 %vm199_vm3, %v436_v19 }
  0x2f   : > { %1225 = vmatprep.mubr.msk.f32.mxu1 %vm199_vm3, %v435_v18  ;;  %1269 = vmatprep.mubr.msk.f32.mxu0 %vm199_vm3, %v431_v14 }
  0x32   : > { %1226 = vmatmul.mubr.msk.f32.gmra.mrb[8].mxu1 %vm199_vm3, %v436_v19  ;;  %1270 = vmatmul.mubr.msk.f32.vlgmr.msra.gmra.mrb[0].mxu0 %vm199_vm3, %v432_v15 }
  0x33   : > { %1228 = vmatprep.mubr.msk.f32.mxu1 %vm199_vm3, %v189_v20  ;;  %1272 = vmatprep.mubr.msk.f32.mxu0 %vm199_vm3, %v433_v16 }
  0x36   : > { %1229 = vmatmul.mubr.msk.f32.gmra.mrb[10].mxu1 %vm199_vm3, %v190_v21  ;;  %1273 = vmatmul.mubr.msk.f32.gmra.mrb[2].mxu0 %vm199_vm3, %v434_v17 }
  0x37   : > { %1231 = vmatprep.mubr.msk.f32.mxu1 %vm199_vm3, %v191_v22  ;;  %1275 = vmatprep.mubr.msk.f32.mxu0 %vm199_vm3, %v435_v18 }
  0x3a   : > { %1232 = vmatmul.mubr.msk.f32.gmra.mrb[12].mxu1 %vm199_vm3, %v192_v23  ;;  %1276 = vmatmul.mubr.msk.f32.gmra.mrb[4].mxu0 %vm199_vm3, %v436_v19 }
  0x3b   : > { %1234 = vmatprep.mubr.msk.f32.mxu1 %vm199_vm3, %v193_v24  ;;  %1278 = vmatprep.mubr.msk.f32.mxu0 %vm199_vm3, %v189_v20 }
  0x3e   : > { %1235 = vmatmul.mubr.msk.f32.gmra.mrb[14].mxu1 %vm199_vm3, %v194_v25  ;;  %1279 = vmatmul.mubr.msk.f32.gmra.mrb[6].mxu0 %vm199_vm3, %v190_v21 }
  0x3f   : > { %1253 = vmatprep.mubr.msk.f32.mxu1 %vm199_vm3, %v189_v20  ;;  %1281 = vmatprep.mubr.msk.f32.mxu0 %vm199_vm3, %v191_v22 }
  0x42   : > { %1254 = vmatmul.mubr.msk.f32.vlgmr.msra.gmra.mrb[8].mxu1 %vm199_vm3, %v190_v21  ;;  %1282 = vmatmul.mubr.msk.f32.gmra.mrb[8].mxu0 %vm199_vm3, %v192_v23 }
  0x43   : > { %1256 = vmatprep.mubr.msk.f32.mxu1 %vm199_vm3, %v191_v22  ;;  %1284 = vmatprep.mubr.msk.f32.mxu0 %vm199_vm3, %v193_v24 }
  0x46   : > { %1257 = vmatmul.mubr.msk.f32.gmra.mrb[10].mxu1 %vm199_vm3, %v192_v23  ;;  %1285 = vmatmul.mubr.msk.f32.gmra.mrb[10].mxu0 %vm199_vm3, %v194_v25 }
  0x47   : > { %1259 = vmatprep.mubr.msk.f32.mxu1 %vm199_vm3, %v193_v24  ;;  %1287 = vmatprep.mubr.msk.f32.mxu0 %vm199_vm3, %v705_v26 }
  0x4a   : > { %1260 = vmatmul.mubr.msk.f32.gmra.mrb[12].mxu1 %vm199_vm3, %v194_v25  ;;  %1288 = vmatmul.mubr.msk.f32.gmra.mrb[12].mxu0 %vm199_vm3, %v706_v27 }
  0x4b   : > { %1262 = vmatprep.mubr.msk.f32.mxu1 %vm199_vm3, %v705_v26  ;;  %1290 = vmatprep.mubr.msk.f32.mxu0 %vm199_vm3, %v707_v28 }
  0x4e   : > { %1263 = vmatmul.mubr.msk.f32.gmra.mrb[14].mxu1 %vm199_vm3, %v706_v27  ;;  %1291 = vmatmul.mubr.msk.f32.gmra.mrb[14].mxu0 %vm199_vm3, %v708_v29 }
  0xf5   : > { %v1215_v30 = vpop.f32.mrb[0].mxu1 }
  0xf6   : > { %v318_v31 = vpop.f32.mrb[1].mxu1 }
  0xf9   : > { %v1218_v32 = vpop.f32.mrb[2].mxu1 }
  0xfa   : > { %v328_v33 = vpop.f32.mrb[3].mxu1 }
  0xfd   : > { %v1221_v34 = vpop.f32.mrb[4].mxu1 }
  0xfe   : > { %v338_v35 = vpop.f32.mrb[5].mxu1 }
 0x101   : > { %v1224_v36 = vpop.f32.mrb[6].mxu1 }
 0x102   : > { %v348_v37 = vpop.f32.mrb[7].mxu1 }
 0x105   : > { %v1271_v38 = vpop.f32.mrb[0].mxu0 }
 0x106   : > { %v1313_v39 = vadd.f32 %v1271_v38, %v1215_v30  ;;  %v830_v40 = vpop.f32.mrb[1].mxu0 }
 0x107   : > { %v1314_v41 = vadd.f32 %v830_v40, %v318_v31 }
 0x108   : > { %958 = vst [vmem:[%s1725_s8 + $0x8] sm:$0xff] %v1313_v39 }
 0x109   : > { %957 = vst [vmem:[%s1725_s8] sm:$0xff] %v1314_v41  ;;  %v1274_v42 = vpop.f32.mrb[2].mxu0 }
 0x10a   : > { %v1315_v43 = vadd.f32 %v1274_v42, %v1218_v32  ;;  %v840_v44 = vpop.f32.mrb[3].mxu0 }
 0x10b   : > { %v1316_v45 = vadd.f32 %v840_v44, %v328_v33 }
 0x10c   : > { %960 = vst [vmem:[%s1725_s8 + $0x18] sm:$0xff] %v1315_v43 }
 0x10d   : > { %959 = vst [vmem:[%s1725_s8 + $0x10] sm:$0xff] %v1316_v45  ;;  %v1277_v46 = vpop.f32.mrb[4].mxu0 }
 0x10e   : > { %v1317_v47 = vadd.f32 %v1277_v46, %v1221_v34  ;;  %v850_v48 = vpop.f32.mrb[5].mxu0 }
 0x10f   : > { %v1318_v49 = vadd.f32 %v850_v48, %v338_v35 }
 0x110   : > { %962 = vst [vmem:[%s1725_s8 + $0x28] sm:$0xff] %v1317_v47 }
 0x111   : > { %961 = vst [vmem:[%s1725_s8 + $0x20] sm:$0xff] %v1318_v49  ;;  %v1280_v50 = vpop.f32.mrb[6].mxu0 }
 0x112   : > { %v1319_v51 = vadd.f32 %v1280_v50, %v1224_v36  ;;  %v860_v52 = vpop.f32.mrb[7].mxu0 }
 0x113   : > { %v1320_v53 = vadd.f32 %v860_v52, %v348_v37 }
 0x114   : > { %964 = vst [vmem:[%s1725_s8 + $0x38] sm:$0xff] %v1319_v51 }
 0x115   : > { %963 = vst [vmem:[%s1725_s8 + $0x30] sm:$0xff] %v1320_v53  ;;  %v1255_v54 = vpop.f32.mrb[8].mxu1  ;;  %v1283_v55 = vpop.f32.mrb[8].mxu0 }
 0x116   : > { %v1321_v56 = vadd.f32 %v1283_v55, %v1255_v54  ;;  %v606_v57 = vpop.f32.mrb[9].mxu1  ;;  %v870_v58 = vpop.f32.mrb[9].mxu0 }
 0x117   : > { %v1322_v59 = vadd.f32 %v870_v58, %v606_v57 }
 0x118   : > { %966 = vst [vmem:[%s1725_s8 + $0x48] sm:$0xff] %v1321_v56 }
 0x119   : > { %965 = vst [vmem:[%s1725_s8 + $0x40] sm:$0xff] %v1322_v59  ;;  %v1258_v60 = vpop.f32.mrb[10].mxu1  ;;  %v1286_v61 = vpop.f32.mrb[10].mxu0 }
 0x11a   : > { %v1323_v62 = vadd.f32 %v1286_v61, %v1258_v60  ;;  %v616_v63 = vpop.f32.mrb[11].mxu1  ;;  %v880_v0 = vpop.f32.mrb[11].mxu0 }
 0x11b   : > { %v1324_v1 = vadd.f32 %v880_v0, %v616_v63 }
 0x11c   : > { %968 = vst [vmem:[%s1725_s8 + $0x58] sm:$0xff] %v1323_v62 }
 0x11d   : > { %967 = vst [vmem:[%s1725_s8 + $0x50] sm:$0xff] %v1324_v1  ;;  %v1261_v2 = vpop.f32.mrb[12].mxu1  ;;  %v1289_v3 = vpop.f32.mrb[12].mxu0 }
 0x11e   : > { %v1325_v4 = vadd.f32 %v1289_v3, %v1261_v2  ;;  %v626_v5 = vpop.f32.mrb[13].mxu1  ;;  %v890_v6 = vpop.f32.mrb[13].mxu0 }
 0x11f   : > { %v1326_v7 = vadd.f32 %v890_v6, %v626_v5 }
 0x120   : > { %970 = vst [vmem:[%s1725_s8 + $0x68] sm:$0xff] %v1325_v4 }
 0x121   : > { %969 = vst [vmem:[%s1725_s8 + $0x60] sm:$0xff] %v1326_v7  ;;  %v1264_v8 = vpop.f32.mrb[14].mxu1  ;;  %v1292_v9 = vpop.f32.mrb[14].mxu0 }
 0x122   : > { %v1327_v10 = vadd.f32 %v1292_v9, %v1264_v8  ;;  %v636_v11 = vpop.f32.mrb[15].mxu1  ;;  %v900_v12 = vpop.f32.mrb[15].mxu0 }
 0x123   : > { %v1328_v13 = vadd.f32 %v900_v12, %v636_v11 }
 0x124   : > { %972 = vst [vmem:[%s1725_s8 + $0x78] sm:$0xff] %v1327_v10 }
 0x125   : > { %971 = vst [vmem:[%s1725_s8 + $0x70] sm:$0xff] %v1328_v13 }
 0x126   : > { %1434 = shalt.err (!%p1431_p7)
}
 0x127   : > { %s1435_s5 = scalar_lea.hbm %s1747_s26, 2048  ;;  %s1439_s8 = scalar_lea.hbm %s1809_s2, 8192 }
 0x128   : > { %p1436_p9 = scmp.ne.s32.totalorder %s1747_s26, %s1435_s5  ;;  %p1440_p12 = scmp.lt.u32.totalorder %s1747_s26, %s1809_s2 }
 0x129   : > { %p1441_p13 = scmp.lt.u32.totalorder %s1439_s8, %s1435_s5  ;;  %p1443_p1 = scmp.lt.u32.totalorder %s1435_s5, %s1747_s26 }
 0x12a   : > { %p1437_p10 = pnand %p1436_p9, %p1587_p3 }
 0x12b   : > { %p1442_p0 = por %p1441_p13, %p1440_p12 }
 0x12c   : > { %p1438_p11 = pneg %p1437_p10 }
 0x12d   : > { %p1444_p2 = por %p1443_p1, %p1442_p0 }
 0x12f   : > { %p1445_p4 = pnand %p1444_p2, %p1438_p11 }
 0x131   : > { %1448 = shalt.err (!%p1445_p4)
}
 0x132   : > { %s1519_s21 = smov 128   ;;  %s1520_s12 = smov 8  }
 0x133   : > { %1347 = dma.vmem_to_hbm [thread:$0]  (%p1587_p3), %s1749_s13, 2048, %s1747_s26, %s1755_s28, %s1519_s21, %s1519_s21, %s1520_s12  }
 0x134 PF: > { %p1353_p5 = scmp.ge.s32.totalorder %s1515_s16, 2  ;;  %s1005_s24 = sand.u32 1, %s1487_s9  }
 0x135   : > { %s1006_s25 = scalar_lea.sflag [#allocation4], %s1005_s24 }
 0x136   : > { %p1350_p6 = pnand %p1353_p5, %p1596_p8 }
 0x138   : > { %1482 = dma.done.wait (!%p1350_p6), %s1006_s25, 2048  }
 0x139   : > { %1484 = vsyncadd (!%p1350_p6), %s1006_s25, 4294965248  ;;  %s15_s16 = sadd.s32 1, %s1515_s16   ;;  %s1814_s9 = smov %s1491_s10 }
 0x13a   : > { %p12_p7 = scmp.ge.s32.totalorder %s15_s16, 6   ;;  %s1815_s10 = smov %s1495_s11 }
 0x13b   : > { %s1816_s11 = smov %s1605_s27  ;;  %s1817_s12 = smov %s1507_s14 }
 0x13c   : > { %s1818_s13 = smov %s1511_s15  ;;  %s1819_s14 = smov %s1822_s19 }
 0x13d   : > { %s1820_s15 = smov %s1826_s20  ;;  %14 = sbr.rel (!%p12_p7) target bundleno = 5 (0x5), region = 66 }
 0x144   :  { %1011 = vsyncpa [#allocation4], 1 }
 0x145   :  { %1013 = vsyncpa [#allocation4 + $0x1], 1 }

</bundles_post_ra>
